<compile_context>
chip_gen: v7x
topology: tpu7x:2x2x1
jax: 0.10.0
libtpu: 0.0.40
codegen_flags: <defaults>
</compile_context>

<pallas_src>
import functools

import jax
import jax.numpy as jnp
from jax.experimental import pallas as pl
from jax.experimental.pallas import tpu as pltpu


# Below this weight size, a Pallas launch is pure overhead -> plain jnp.dot.
_PALLAS_MIN_WEIGHT_ELEMS = 128 * 128


def _round_up(v: int, m: int) -> int:
    return ((v + m - 1) // m) * m


def _matmul_kernel(x_ref, w_ref, o_ref, acc_ref):
    """One (tm, tn) output tile, accumulated over the K grid axis."""
    @pl.when(pl.program_id(2) == 0)
    def _init():
        acc_ref[...] = jnp.zeros_like(acc_ref)

    acc_ref[...] += jnp.dot(
        x_ref[...], w_ref[...], preferred_element_type=jnp.float32
    )

    @pl.when(pl.program_id(2) == pl.num_programs(2) - 1)
    def _store():
        o_ref[...] = acc_ref[...].astype(o_ref.dtype)


@functools.partial(jax.jit, static_argnames=())
def _matmul_lane_dense(x_t: jax.Array, w_t: jax.Array) -> jax.Array:
    """(B, K) @ (K, N) -> (B, N), tiled Pallas matmul with lane-dense output."""
    B, K = x_t.shape
    K2, N = w_t.shape
    assert K == K2, "contraction dims must match"

    # Tile sizes: MXU-aligned (multiples of 128/256 on lanes, 8 on sublanes),
    # capped so double-buffered blocks stay far below the v7x 64 MiB VMEM.
    tm = min(256, _round_up(B, 8))
    tk = min(512, _round_up(K, 128))
    tn = min(256, _round_up(N, 128))

    Bp = _round_up(B, tm)
    Kp = _round_up(K, tk)
    Np = _round_up(N, tn)

    if (Bp, Kp) != (B, K):
        x_t = jnp.pad(x_t, ((0, Bp - B), (0, Kp - K)))
    if (Kp, Np) != (K, N):
        w_t = jnp.pad(w_t, ((0, Kp - K), (0, Np - N)))

    grid = (Bp // tm, Np // tn, Kp // tk)

    # TODO(synk): if the GEMV regime is DMA-exposed on v7x, add
    # pipeline_mode=pl.Buffered(3) on the weights BlockSpec.
    out = pl.pallas_call(
        _matmul_kernel,
        out_shape=jax.ShapeDtypeStruct((Bp, Np), jnp.float32),
        grid=grid,
        in_specs=[
            pl.BlockSpec((tm, tk), lambda i, j, k: (i, k)),
            pl.BlockSpec((tk, tn), lambda i, j, k: (k, j)),
        ],
        out_specs=pl.BlockSpec((tm, tn), lambda i, j, k: (i, j)),
        scratch_shapes=[pltpu.VMEM((tm, tn), jnp.float32)],
        compiler_params=pltpu.CompilerParams(
            dimension_semantics=("parallel", "parallel", "arbitrary"),
            vmem_limit_bytes=48 * 1024 * 1024,
        ),
        cost_estimate=pl.CostEstimate(
            flops=2 * Bp * Kp * Np,
            transcendentals=0,
            bytes_accessed=4 * (Bp * Kp + Kp * Np + Bp * Np),
        ),
    )(x_t, w_t)

    if (Bp, Np) != (B, N):
        out = out[:B, :N]
    return out


def linear_forward(weights: jax.Array, x: jax.Array, *,
                   weights_t: jax.Array | None = None) -> jax.Array:
    """Equivalent of Linear.forward: weights @ x.

    weights: (n_out, n_in) float32
    x:       (n_in,) or (n_in, batch) float32
    weights_t: optional pre-transposed (n_in, n_out) copy (avoids a per-call
               transpose when the caller can cache it, e.g. LinearPallas).
    """
    squeeze = x.ndim == 1
    if squeeze:
        x = x[:, None]

    n_out, n_in = weights.shape
    assert x.shape[0] == n_in, "x first dim must equal n_in"

    if n_out * n_in < _PALLAS_MIN_WEIGHT_ELEMS:
        # Tiny layer: per-grid-step + launch overhead dominates; use XLA dot.
        out = jnp.dot(weights.astype(jnp.float32), x.astype(jnp.float32))
    else:
        if weights_t is None:
            weights_t = weights.T
        # Lane-dense: out.T = x.T @ weights.T, so n_out lands on the lane axis.
        out_t = _matmul_lane_dense(
            x.T.astype(jnp.float32), weights_t.astype(jnp.float32)
        )
        out = out_t.T

    return out[:, 0] if squeeze else out


class LinearPallas:
    """Mirror of rectipy.edges.Linear with deterministic weight init."""

    def __init__(self, n_in: int, n_out: int, key: jax.Array):
        self.n_in = n_in
        self.n_out = n_out
        # torch.randn(n_out, n_in) equivalent, deterministic. (f32, not f64.)
        self.weights = jax.random.normal(key, (n_out, n_in), dtype=jnp.float32)
        # Cached transposed copy so the lane-dense kernel needs no per-call
        # transpose of the weights.
        self._weights_t = jnp.asarray(self.weights.T)

    def __call__(self, x: jax.Array) -> jax.Array:
        return linear_forward(self.weights, x, weights_t=self._weights_t)


def _ref_matmul(w: jax.Array, x: jax.Array) -> jax.Array:
    # Full-precision f32 reference (avoids XLA's default reduced-precision dot).
    return jnp.dot(w, x, precision=jax.lax.Precision.HIGHEST)


if __name__ == "__main__":
    key = jax.random.PRNGKey(0)
    k_w, k_x, k_w2, k_x2 = jax.random.split(key, 4)

    # --- Main case: goes through the tiled Pallas kernel. -------------------
    n_in, n_out, batch = 256, 512, 8
    layer = LinearPallas(n_in, n_out, k_w)
    x = jax.random.normal(k_x, (n_in, batch), dtype=jnp.float32)

    y = jax.block_until_ready(layer(x))
    y_ref = _ref_matmul(layer.weights, x)
    assert y.shape == (n_out, batch)
    assert jnp.allclose(y, y_ref, atol=1e-3, rtol=1e-3), "2-D path mismatch"

    # --- 1-D (single input vector / GEMV) path, same layer. -----------------
    x_vec = x[:, 0]
    y_vec = jax.block_until_ready(layer(x_vec))
    assert y_vec.shape == (n_out,)
    assert jnp.allclose(
        y_vec, _ref_matmul(layer.weights, x_vec), atol=1e-3, rtol=1e-3
    ), "1-D path mismatch"

    # --- Non-tile-aligned shapes (exercises padding + output slicing). ------
    n_in2, n_out2, batch2 = 200, 136, 3
    layer2 = LinearPallas(n_in2, n_out2, k_w2)
    x2 = jax.random.normal(k_x2, (n_in2, batch2), dtype=jnp.float32)
    y2 = jax.block_until_ready(layer2(x2))
    assert y2.shape == (n_out2, batch2)
    assert jnp.allclose(
        y2, _ref_matmul(layer2.weights, x2), atol=1e-3, rtol=1e-3
    ), "unaligned path mismatch"

    # --- Tiny layer: shape-based fallback to jnp.dot (no Pallas launch). ----
    layer3 = LinearPallas(32, 16, k_w)
    x3 = jax.random.normal(k_x, (32, 2), dtype=jnp.float32)
    y3 = jax.block_until_ready(layer3(x3))
    assert jnp.allclose(
        y3, _ref_matmul(layer3.weights, x3), atol=1e-4, rtol=1e-4
    ), "fallback path mismatch"

    print("KERNEL_OK")
</pallas_src>

<mosaic_0001>
module attributes {stable_mosaic.version = 11 : i64} {
  func.func @_matmul_kernel(%arg0: i32, %arg1: i32, %arg2: i32, %arg3: memref<8x256xf32, #tpu.memory_space<vmem>>, %arg4: memref<256x256xf32, #tpu.memory_space<vmem>>, %arg5: memref<8x256xf32, #tpu.memory_space<vmem>>, %arg6: memref<8x256xf32, #tpu.memory_space<vmem>>) attributes {dimension_semantics = [#tpu.dimension_semantics<parallel>, #tpu.dimension_semantics<parallel>, #tpu.dimension_semantics<arbitrary>], iteration_bounds = array<i64: 1, 2, 1>, scalar_prefetch = 0 : i64, scratch_operands = 1 : i64, tpu.core_type = #tpu.core_type<tc>, window_params = [{transform_indices = @transform_0, window_bounds = array<i64: 8, 256>}, {transform_indices = @transform_1, window_bounds = array<i64: 256, 256>}, {transform_indices = @transform_2, window_bounds = array<i64: 8, 256>}]} {
    %c0_i32 = arith.constant 0 : i32
    %0 = arith.cmpi eq, %arg2, %c0_i32 : i32
    %1 = arith.extui %0 : i1 to i32
    %c0_i32_0 = arith.constant 0 : i32
    %2 = arith.cmpi ne, %1, %c0_i32_0 : i32
    scf.if %2 {
      %cst_10 = arith.constant 0.000000e+00 : f32
      %12 = vector.broadcast %cst_10 : f32 to vector<8x256xf32>
      %c0_11 = arith.constant 0 : index
      %c0_12 = arith.constant 0 : index
      %13 = vector.load %arg6[%c0_11, %c0_12] : memref<8x256xf32, #tpu.memory_space<vmem>>, vector<8x256xf32>
      tpu.vector_store %arg6[%c0_11, %c0_12], %12 {strides = array<i32>} : memref<8x256xf32, #tpu.memory_space<vmem>>, vector<8x256xf32>,
    } else {
    }
    %c0 = arith.constant 0 : index
    %c0_1 = arith.constant 0 : index
    %3 = vector.load %arg6[%c0, %c0_1] : memref<8x256xf32, #tpu.memory_space<vmem>>, vector<8x256xf32>
    %c0_2 = arith.constant 0 : index
    %c0_3 = arith.constant 0 : index
    %4 = vector.load %arg3[%c0_2, %c0_3] : memref<8x256xf32, #tpu.memory_space<vmem>>, vector<8x256xf32>
    %c0_4 = arith.constant 0 : index
    %c0_5 = arith.constant 0 : index
    %5 = vector.load %arg4[%c0_4, %c0_5] : memref<256x256xf32, #tpu.memory_space<vmem>>, vector<256x256xf32>
    %cst = arith.constant dense<0.000000e+00> : vector<8x256xf32>
    %6 = tpu.matmul %4, %5, %cst {dimension_numbers = #tpu.dot_dimension_numbers<[1], [0], [0], [1], [0, 0, 1, 1], [], []>} : vector<8x256xf32>, vector<256x256xf32>, vector<8x256xf32> -> vector<8x256xf32>
    %7 = arith.addf %3, %6 : vector<8x256xf32>
    %c0_6 = arith.constant 0 : index
    %c0_7 = arith.constant 0 : index
    %8 = vector.load %arg6[%c0_6, %c0_7] : memref<8x256xf32, #tpu.memory_space<vmem>>, vector<8x256xf32>
    tpu.vector_store %arg6[%c0_6, %c0_7], %7 {strides = array<i32>} : memref<8x256xf32, #tpu.memory_space<vmem>>, vector<8x256xf32>,
    %c0_i32_8 = arith.constant 0 : i32
    %9 = arith.cmpi eq, %arg2, %c0_i32_8 : i32
    %10 = arith.extui %9 : i1 to i32
    %c0_i32_9 = arith.constant 0 : i32
    %11 = arith.cmpi ne, %10, %c0_i32_9 : i32
    scf.if %11 {
      %c0_10 = arith.constant 0 : index
      %c0_11 = arith.constant 0 : index
      %12 = vector.load %arg6[%c0_10, %c0_11] : memref<8x256xf32, #tpu.memory_space<vmem>>, vector<8x256xf32>
      %c0_12 = arith.constant 0 : index
      %c0_13 = arith.constant 0 : index
      %13 = vector.load %arg5[%c0_12, %c0_13] : memref<8x256xf32, #tpu.memory_space<vmem>>, vector<8x256xf32>
      tpu.vector_store %arg5[%c0_12, %c0_13], %12 {strides = array<i32>} : memref<8x256xf32, #tpu.memory_space<vmem>>, vector<8x256xf32>,
    } else {
    }
    return
  }
  func.func @transform_0(%arg0: i32, %arg1: i32, %arg2: i32) -> (i32, i32) {
    %c0_i32 = arith.constant 0 : i32
    return %arg0, %arg2 : i32, i32
  }
  func.func @transform_1(%arg0: i32, %arg1: i32, %arg2: i32) -> (i32, i32) {
    %c0_i32 = arith.constant 0 : i32
    return %arg2, %arg1 : i32, i32
  }
  func.func @transform_2(%arg0: i32, %arg1: i32, %arg2: i32) -> (i32, i32) {
    %c0_i32 = arith.constant 0 : i32
    return %arg0, %arg1 : i32, i32
  }
}

</mosaic_0001>

<bundles_post_ra>
// kernel: _matmul_lane_dense.1
= control target key start
LH: loop header
LB: loop body
LE: loop exit
PB: predicated region body
PF: predicated region fallthrough
CT: control target
= control target key end

     0   :  { %7 = vsyncpa [#allocation4], 0  ;;  %s1106_s0 = inlined_call_operand.hbm [shape: f32[8,256], index: 0, kind: input, shape index: {}]   ;;  %s1107_s1 = inlined_call_operand.hbm [shape: f32[256,512], index: 1, kind: input, shape index: {}]   ;;  %s1108_s2 = inlined_call_operand.hbm [shape: f32[8,512], index: 2, kind: output, shape index: {}]  }
   0x1   :  { %8 = vsyncpa [#allocation7], 0 }
   0x2   :  { %10 = vsyncpa [#allocation7 + $0x1], 0 }
   0x3   :  { %11 = vsyncpa [#allocation5], 0 }
   0x4   :  { %13 = vsyncpa [#allocation5 + $0x1], 0  ;;  %s820_s9 = smov 0   ;;  %s822_s10 = smov 0  }
   0x5   :  { %s824_s11 = smov 0   ;;  %s826_s12 = smov 0  }
   0x6   :  { %s828_s13 = smov 0   ;;  %s830_s14 = smov 0  }
   0x7 LB: > { %s494_s15 = sadd.s32 4294967295, %s797_s14   ;;  %s495_s16 = sadd.s32 4294967294, %s797_s14   ;;  %s797_s14 = sphi %s830_s14, %s19_s14   ;;  %s793_s13 = sphi %s828_s13, %s1136_s13   ;;  %s789_s12 = sphi %s826_s12, %s1135_s12   ;;  %s785_s11 = sphi %s824_s11, %s1134_s11   ;;  %s781_s10 = sphi %s822_s10, %s1133_s10   ;;  %s777_s9 = sphi %s820_s9, %s1132_s9  }
   0x8   : > { %s75_s17 = sadd.s32 1, %s785_s11  ;;  %p82_p0 = scmp.ne.s32.totalorder %s785_s11, %s781_s10 }
   0x9   : > { %p83_p1 = scmp.eq.s32.totalorder %s797_s14, 0  ;;  %p88_p2 = scmp.ne.s32.totalorder %s781_s10, %s777_s9 }
   0xa   : > { %p858_p3 = scmp.eq.s32.totalorder %s494_s15, 0  ;;  %p114_p4 = scmp.eq.s32.totalorder %s494_s15, 1 }
   0xb   : > { %p862_p5 = por %p83_p1, %p82_p0  ;;  %p120_p6 = scmp.eq.s32.totalorder %s495_s16, 1 }
   0xc   : > { %s1115_s18 = scalar_select %p858_p3, 1, 0 }
   0xd   : > { %p868_p7 = por %p858_p3, %p88_p2  ;;  %p872_p8 = por %p114_p4, %p82_p0 }
   0xe   : > { %p876_p9 = por %p120_p6, %p88_p2  ;;  %p496_p10 = scmp.ge.s32.totalorder %s797_s14, 1 }
   0xf   : > { %s1117_s20 = scalar_select %p868_p7, 1, 0 }
  0x10   : > { %s1118_s21 = scalar_select %p872_p8, 1, 0 }
  0x11   : > { %s1119_s22 = scalar_select %p876_p9, 1, 0 }
  0x12   : > { %p127_p11 = scmp.lt.s32.totalorder %s797_s14, 3  ;;  %s799_s24 = smov [#allocation3]  }
  0x13   : > { %s145_s25 = sshll.u32 %s799_s24, 4  ;;  %p598_p1 = scmp.lt.s32.totalorder %s797_s14, 2  ;;  %s146_s25 = int_to_ptr.vmem [resolvable:$true] %s145_s25 }
  0x14   : > { %p883_p13 = pnand %p496_p10, %p127_p11  ;;  %s34_s28 = sadd.s32 1, %s793_s13 }
  0x15   : > { %p892_p4 = pnand %p598_p1, %p862_p5  ;;  %p903_p6 = scmp.ge.s32.totalorder %s34_s28, 2 }
  0x16   : > { %s1120_s23 = scalar_select %p883_p13, 1, 0 }
  0x17   : > { %p585_p0 = pneg %p883_p13  ;;  %s156_s30 = sand.u32 1, %s785_s11  }
  0x18   : > { %s1121_s26 = scalar_select %p892_p4, 1, 0 }
  0x19   : > { %p898_p2 = pnand %p585_p0, %p858_p3  ;;  %s653_s5 = scalar_lea.hbm %s1106_s0, 256 }
  0x1a   : > { %s1123_s29 = scalar_select %p903_p6, 1, 0 }
  0x1b   : > { %p654_p5 = scmp.ne.s32.totalorder %s1106_s0, %s653_s5  ;;  %p655_p10 = pneg %p898_p2 }
  0x1c   : > { %p660_p0 = scmp.lt.u32.totalorder %s653_s5, %s1106_s0 }
  0x1d   : > { %p656_p11 = pnand %p655_p10, %p654_p5 }
  0x1f   : > { %p657_p1 = pneg %p656_p11 }
  0x21   : > { %p662_p12 = pnand %p660_p0, %p657_p1 }
  0x23   : > { %665 = shalt.err (!%p662_p12)
}
  0x24   : > { %s666_s16 = scalar_lea.vmem %s146_s25, 256  ;;  %p674_p3 = scmp.lt.s32.totalorder %s146_s25, %s146_s25 }
  0x25   : > { %p667_p9 = scmp.ne.s32.totalorder %s146_s25, %s666_s16  ;;  %p675_p13 = scmp.lt.s32.totalorder %s666_s16, %s666_s16 }
  0x27   : > { %p669_p8 = pnand %p667_p9, %p655_p10  ;;  %p676_p4 = por %p675_p13, %p674_p3 }
  0x29   : > { %p670_p7 = pneg %p669_p8 }
  0x2b   : > { %p677_p6 = pnand %p676_p4, %p670_p7 }
  0x2d   : > { %680 = shalt.err (!%p677_p6)
}
  0x2e   : > { %588 = dma.hbm_to_vmem [thread:$0]  (!%p898_p2), %s1106_s0, 256, %s146_s25, [#allocation4]  }
  0x2f   : > { %p1124_p9 = scmp.ne.s32.totalorder %s1123_s29, 0  ;;  %s499_s3 = sshll.u32 %s156_s30, 9 }
  0x30   : > { %s511_s5 = sshll.u32 %s793_s13, 8  ;;  %s160_s8 = scalar_lea.vmem [#allocation6], %s499_s3 }
  0x31   : > { %s1138_s28 = smov (%p1124_p9, %s34_s28), 0  ;;  %s934_s7 = scalar_lea.hbm %s1107_s1, %s511_s5 }
  0x32   : > { %s71_s4 = ssub.s32 %s793_s13, %s1138_s28  ;;  %s170_s15 = sshll.u32 %s160_s8, 4  ;;  %s941_s15 = int_to_ptr.vmem [resolvable:$true] %s170_s15 }
  0x33   : > { %p73_p3 = scmp.eq.s32.totalorder %s71_s4, 0  ;;  %s943_s29 = scalar_lea.sflag [#allocation7], %s156_s30 }
  0x34   : > { %s681_s16 = scalar_lea.hbm %s934_s7, 8192  ;;  %p1125_p8 = scmp.ne.s32.totalorder %s1121_s26, 0 }
  0x35   : > { %s939_s25 = scalar_select %p73_p3, %s785_s11, %s75_s17  }
  0x36   : > { %p682_p7 = scmp.ne.s32.totalorder %s934_s7, %s681_s16  ;;  %p683_p12 = pneg %p1125_p8 }
  0x37   : > { %s686_s3 = scalar_lea.hbm %s1107_s1, 16384  ;;  %p687_p2 = scmp.lt.u32.totalorder %s934_s7, %s1107_s1 }
  0x38   : > { %p684_p13 = pnand %p683_p12, %p682_p7  ;;  %p688_p6 = scmp.lt.u32.totalorder %s686_s3, %s681_s16 }
  0x39   : > { %p690_p10 = scmp.lt.u32.totalorder %s681_s16, %s934_s7 }
  0x3a   : > { %p685_p4 = pneg %p684_p13  ;;  %p689_p5 = por %p688_p6, %p687_p2 }
  0x3c   : > { %p691_p11 = por %p690_p10, %p689_p5 }
  0x3e   : > { %p692_p1 = pnand %p691_p11, %p685_p4 }
  0x40   : > { %695 = shalt.err (!%p692_p1)
}
  0x41   : > { %s696_s17 = scalar_lea.vmem %s941_s15, 8192  ;;  %s800_s30 = smov [#allocation6]  }
  0x42   : > { %p697_p0 = scmp.ne.s32.totalorder %s941_s15, %s696_s17  ;;  %s701_s27 = sshll.u32 %s800_s30, 4  ;;  %s702_s27 = int_to_ptr.vmem [resolvable:$false] %s701_s27 }
  0x43   : > { %s703_s6 = scalar_lea.vmem %s702_s27, 16384  ;;  %p704_p7 = scmp.lt.s32.totalorder %s941_s15, %s702_s27 }
  0x44   : > { %p699_p9 = pnand %p697_p0, %p683_p12  ;;  %p705_p13 = scmp.lt.s32.totalorder %s703_s6, %s696_s17 }
  0x46   : > { %p700_p3 = pneg %p699_p9  ;;  %p706_p2 = por %p705_p13, %p704_p7 }
  0x48   : > { %p707_p6 = pnand %p706_p2, %p700_p3 }
  0x4a   : > { %710 = shalt.err (!%p707_p6)
}
  0x4b   : > { %s801_s8 = smov 512   ;;  %s802_s16 = smov 256  }
  0x4c   : > { %s803_s19 = smov 16   ;;  %p1126_p12 = scmp.ne.s32.totalorder %s1120_s23, 0 }
  0x4d   : > { %592 = dma.hbm_to_vmem [thread:$0]  (!%p1125_p8), %s934_s7, 8192, %s941_s15, %s943_s29, %s801_s8, %s802_s16, %s803_s19  }
  0x4e   : > { %182 = sbr.rel (%p1126_p12) target bundleno = 384 (0x180), region = 28  ;;  %p1127_p4 = scmp.ne.s32.totalorder (!%p1126_p12), %s1115_s18, 0 }
  0x55   : > { %764 = dma.done.wait (%p1127_p4), [#allocation4], 256  }
  0x56   : > { %766 = vsyncadd (%p1127_p4), [#allocation4], 4294967040  ;;  %s978_s24 = sand.u32 1, %s781_s10   ;;  %p1128_p8 = scmp.ne.s32.totalorder %s1117_s20, 0 }
  0x57   : > { %s504_s3 = sshll.u32 %s978_s24, 9  ;;  %s189_s4 = scalar_lea.sflag [#allocation7], %s978_s24 }
  0x58   : > { %s982_s5 = scalar_lea.vmem [#allocation6], %s504_s3 }
  0x59   : > { %768 = dma.done.wait (%p1128_p8), %s189_s4, 8192  }
  0x5a   : > { %770 = vsyncadd (%p1128_p8), %s189_s4, 4294959104  ;;  %v228_v0 = vld [vmem:[%s982_s5 + $0x8] sm:$0xff]  ;;  %v230_v1 = vld [vmem:[%s982_s5 + $0x18] sm:$0xff]  ;;  %s505_s18 = sshll.u32 %s978_s24, 4  ;;  %s512_s26 = sshll.u32 %s789_s12, 8 }
  0x5b   : > { %v227_v2 = vld [vmem:[%s982_s5] sm:$0xff]  ;;  %v513_v3 = vpack.c.bf16 %v230_v1, %v228_v0  ;;  %v229_v4 = vld [vmem:[%s982_s5 + $0x10] sm:$0xff]  ;;  %v232_v5 = vld [vmem:[%s982_s5 + $0x28] sm:$0xff]  ;;  %s212_s20 = scalar_lea.vmem [#allocation8], %s505_s18  ;;  %s1059_s29 = scalar_lea.hbm %s1108_s2, %s512_s26 }
  0x5c   : > { %v234_v6 = vld [vmem:[%s982_s5 + $0x38] sm:$0xff]  ;;  %v515_v7 = vpack.c.bf16 %v229_v4, %v227_v2  ;;  %v231_v9 = vld [vmem:[%s982_s5 + $0x20] sm:$0xff]  ;;  %v233_v10 = vld [vmem:[%s982_s5 + $0x30] sm:$0xff]  ;;  %s390_s23 = sshll.u32 %s212_s20, 4  ;;  %s374_s17 = scalar_lea.sflag [#allocation5], %s978_s24  ;;  %s1054_s23 = int_to_ptr.vmem [resolvable:$true] %s390_s23 }
  0x5d   : > { %v517_v8 = vpack.c.bf16 %v234_v6, %v232_v5  ;;  %v236_v11 = vld [vmem:[%s982_s5 + $0x48] sm:$0xff]  ;;  %514 = vmatprep.subr.bf16.mxu0 %v513_v3  ;;  %v238_v12 = vld [vmem:[%s982_s5 + $0x58] sm:$0xff]  ;;  %v519_v13 = vpack.c.bf16 %v233_v10, %v231_v9  ;;  %v235_v15 = vld [vmem:[%s982_s5 + $0x40] sm:$0xff]  ;;  %s711_s30 = scalar_lea.vmem %s1054_s23, 256  ;;  %p1129_p10 = scmp.ne.s32.totalorder %s1118_s21, 0 }
  0x5e   : > { %516 = vmatpush1.bf16.msra.mxu0 %v515_v7  ;;  %v521_v14 = vpack.c.bf16 %v238_v12, %v236_v11  ;;  %v237_v16 = vld [vmem:[%s982_s5 + $0x50] sm:$0xff]  ;;  %v240_v17 = vld [vmem:[%s982_s5 + $0x68] sm:$0xff]  ;;  %v242_v18 = vld [vmem:[%s982_s5 + $0x78] sm:$0xff]  ;;  %p712_p5 = scmp.ne.s32.totalorder %s1054_s23, %s711_s30  ;;  %s804_s12 = smov [#allocation8]  }
  0x5f   : > { %518 = vmatprep.subr.bf16.mxu0 %v517_v8  ;;  %v523_v19 = vpack.c.bf16 %v237_v16, %v235_v15  ;;  %v525_v20 = vpack.c.bf16 %v242_v18, %v240_v17  ;;  %v239_v21 = vld [vmem:[%s982_s5 + $0x60] sm:$0xff]  ;;  %v241_v22 = vld [vmem:[%s982_s5 + $0x70] sm:$0xff]  ;;  %v244_v23 = vld [vmem:[%s982_s5 + $0x88] sm:$0xff]  ;;  %s715_s27 = sshll.u32 %s804_s12, 4  ;;  %s716_s27 = int_to_ptr.vmem [resolvable:$false] %s715_s27 }
  0x60   : > { %v246_v24 = vld [vmem:[%s982_s5 + $0x98] sm:$0xff]  ;;  %v527_v25 = vpack.c.bf16 %v241_v22, %v239_v21  ;;  %v243_v27 = vld [vmem:[%s982_s5 + $0x80] sm:$0xff]  ;;  %v245_v28 = vld [vmem:[%s982_s5 + $0x90] sm:$0xff]  ;;  %p713_p11 = pnand %p712_p5, %p1129_p10  ;;  %s717_s6 = scalar_lea.vmem %s716_s27, 512 }
  0x61   : > { %v529_v26 = vpack.c.bf16 %v246_v24, %v244_v23  ;;  %v248_v29 = vld [vmem:[%s982_s5 + $0xa8] sm:$0xff]  ;;  %v250_v30 = vld [vmem:[%s982_s5 + $0xb8] sm:$0xff]  ;;  %v531_v31 = vpack.c.bf16 %v245_v28, %v243_v27  ;;  %v247_v33 = vld [vmem:[%s982_s5 + $0xa0] sm:$0xff]  ;;  %p718_p0 = scmp.lt.s32.totalorder %s1054_s23, %s716_s27  ;;  %p719_p9 = scmp.lt.s32.totalorder %s717_s6, %s711_s30 }
  0x62   : > { %520 = vmatpush1.bf16.msra.mxu0 %v519_v13  ;;  %v533_v32 = vpack.c.bf16 %v250_v30, %v248_v29  ;;  %v249_v34 = vld [vmem:[%s982_s5 + $0xb0] sm:$0xff]  ;;  %v252_v35 = vld [vmem:[%s982_s5 + $0xc8] sm:$0xff]  ;;  %v254_v36 = vld [vmem:[%s982_s5 + $0xd8] sm:$0xff]  ;;  %p714_p1 = pneg %p713_p11 }
  0x63   : > { %522 = vmatprep.subr.bf16.mxu0 %v521_v14  ;;  %v535_v37 = vpack.c.bf16 %v249_v34, %v247_v33  ;;  %v537_v38 = vpack.c.bf16 %v254_v36, %v252_v35  ;;  %v251_v39 = vld [vmem:[%s982_s5 + $0xc0] sm:$0xff]  ;;  %v253_v40 = vld [vmem:[%s982_s5 + $0xd0] sm:$0xff]  ;;  %v226_v41 = vld [vmem:[#allocation3 + $0x8] sm:$0xff]  ;;  %p720_p3 = por %p719_p9, %p718_p0 }
  0x64   : > { %v256_v42 = vld [vmem:[%s982_s5 + $0xe8] sm:$0xff]  ;;  %v258_v43 = vld [vmem:[%s982_s5 + $0xf8] sm:$0xff]  ;;  %355 = vmatprep.mubr.f32.mxu0 %v226_v41  ;;  %v539_v44 = vpack.c.bf16 %v253_v40, %v251_v39  ;;  %v255_v46 = vld [vmem:[%s982_s5 + $0xe0] sm:$0xff] }
  0x65   : > { %v541_v45 = vpack.c.bf16 %v258_v43, %v256_v42  ;;  %v257_v47 = vld [vmem:[%s982_s5 + $0xf0] sm:$0xff]  ;;  %v260_v48 = vld [vmem:[%s982_s5 + $0x108] sm:$0xff]  ;;  %v262_v49 = vld [vmem:[%s982_s5 + $0x118] sm:$0xff]  ;;  %p721_p7 = pnand %p720_p3, %p714_p1 }
  0x66   : > { %524 = vmatpush1.bf16.msra.mxu0 %v523_v19  ;;  %v543_v50 = vpack.c.bf16 %v257_v47, %v255_v46  ;;  %v545_v51 = vpack.c.bf16 %v262_v49, %v260_v48  ;;  %v259_v52 = vld [vmem:[%s982_s5 + $0x100] sm:$0xff]  ;;  %v261_v53 = vld [vmem:[%s982_s5 + $0x110] sm:$0xff]  ;;  %v264_v54 = vld [vmem:[%s982_s5 + $0x128] sm:$0xff] }
  0x67   : > { %526 = vmatprep.subr.bf16.mxu0 %v525_v20  ;;  %v266_v55 = vld [vmem:[%s982_s5 + $0x138] sm:$0xff]  ;;  %v547_v56 = vpack.c.bf16 %v261_v53, %v259_v52  ;;  %v263_v58 = vld [vmem:[%s982_s5 + $0x120] sm:$0xff]  ;;  %v265_v59 = vld [vmem:[%s982_s5 + $0x130] sm:$0xff] }
  0x68   : > { %v549_v57 = vpack.c.bf16 %v266_v55, %v264_v54  ;;  %v268_v60 = vld [vmem:[%s982_s5 + $0x148] sm:$0xff]  ;;  %v270_v61 = vld [vmem:[%s982_s5 + $0x158] sm:$0xff]  ;;  %v551_v62 = vpack.c.bf16 %v265_v59, %v263_v58  ;;  %v267_v0 = vld [vmem:[%s982_s5 + $0x140] sm:$0xff] }
  0x69   : > { %v553_v63 = vpack.c.bf16 %v270_v61, %v268_v60  ;;  %v269_v1 = vld [vmem:[%s982_s5 + $0x150] sm:$0xff]  ;;  %v272_v2 = vld [vmem:[%s982_s5 + $0x168] sm:$0xff]  ;;  %v274_v3 = vld [vmem:[%s982_s5 + $0x178] sm:$0xff] }
  0x6a   : > { %528 = vmatpush1.bf16.msra.mxu0 %v527_v25  ;;  %v555_v4 = vpack.c.bf16 %v269_v1, %v267_v0  ;;  %v557_v5 = vpack.c.bf16 %v274_v3, %v272_v2  ;;  %v271_v6 = vld [vmem:[%s982_s5 + $0x160] sm:$0xff]  ;;  %v273_v7 = vld [vmem:[%s982_s5 + $0x170] sm:$0xff]  ;;  %v276_v8 = vld [vmem:[%s982_s5 + $0x188] sm:$0xff] }
  0x6b   : > { %530 = vmatprep.subr.bf16.mxu0 %v529_v26  ;;  %v278_v9 = vld [vmem:[%s982_s5 + $0x198] sm:$0xff]  ;;  %v559_v10 = vpack.c.bf16 %v273_v7, %v271_v6  ;;  %v275_v12 = vld [vmem:[%s982_s5 + $0x180] sm:$0xff]  ;;  %v277_v13 = vld [vmem:[%s982_s5 + $0x190] sm:$0xff] }
  0x6c   : > { %v561_v11 = vpack.c.bf16 %v278_v9, %v276_v8  ;;  %v280_v14 = vld [vmem:[%s982_s5 + $0x1a8] sm:$0xff]  ;;  %v282_v15 = vld [vmem:[%s982_s5 + $0x1b8] sm:$0xff]  ;;  %v563_v16 = vpack.c.bf16 %v277_v13, %v275_v12  ;;  %v279_v18 = vld [vmem:[%s982_s5 + $0x1a0] sm:$0xff] }
  0x6d   : > { %v565_v17 = vpack.c.bf16 %v282_v15, %v280_v14  ;;  %v281_v19 = vld [vmem:[%s982_s5 + $0x1b0] sm:$0xff]  ;;  %v284_v20 = vld [vmem:[%s982_s5 + $0x1c8] sm:$0xff]  ;;  %v286_v21 = vld [vmem:[%s982_s5 + $0x1d8] sm:$0xff] }
  0x6e   : > { %532 = vmatpush1.bf16.msra.mxu0 %v531_v31  ;;  %v567_v22 = vpack.c.bf16 %v281_v19, %v279_v18  ;;  %v569_v23 = vpack.c.bf16 %v286_v21, %v284_v20  ;;  %v283_v24 = vld [vmem:[%s982_s5 + $0x1c0] sm:$0xff]  ;;  %v285_v25 = vld [vmem:[%s982_s5 + $0x1d0] sm:$0xff]  ;;  %v288_v26 = vld [vmem:[%s982_s5 + $0x1e8] sm:$0xff] }
  0x6f   : > { %534 = vmatprep.subr.bf16.mxu0 %v533_v32  ;;  %v290_v27 = vld [vmem:[%s982_s5 + $0x1f8] sm:$0xff]  ;;  %v571_v28 = vpack.c.bf16 %v285_v25, %v283_v24  ;;  %v287_v30 = vld [vmem:[%s982_s5 + $0x1e0] sm:$0xff]  ;;  %v289_v31 = vld [vmem:[%s982_s5 + $0x1f0] sm:$0xff] }
  0x70   : > { %v573_v29 = vpack.c.bf16 %v290_v27, %v288_v26  ;;  %v575_v32 = vpack.c.bf16 %v289_v31, %v287_v30  ;;  %v225_v33 = vld [vmem:[#allocation3] sm:$0xff] }
  0x72   : > { %536 = vmatpush1.bf16.msra.mxu0 %v535_v37 }
  0x73   : > { %538 = vmatprep.subr.bf16.mxu0 %v537_v38 }
  0x76   : > { %540 = vmatpush1.bf16.msra.mxu0 %v539_v44 }
  0x77   : > { %542 = vmatprep.subr.bf16.mxu0 %v541_v45 }
  0x7a   : > { %544 = vmatpush1.bf16.msra.mxu0 %v543_v50 }
  0x7b   : > { %546 = vmatprep.subr.bf16.mxu0 %v545_v51 }
  0x7e   : > { %548 = vmatpush1.bf16.msra.mxu0 %v547_v56 }
  0x7f   : > { %550 = vmatprep.subr.bf16.mxu0 %v549_v57 }
  0x82   : > { %552 = vmatpush1.bf16.msra.mxu0 %v551_v62 }
  0x83   : > { %554 = vmatprep.subr.bf16.mxu0 %v553_v63 }
  0x86   : > { %556 = vmatpush1.bf16.msra.mxu0 %v555_v4 }
  0x87   : > { %558 = vmatprep.subr.bf16.mxu0 %v557_v5 }
  0x8a   : > { %560 = vmatpush1.bf16.msra.mxu0 %v559_v10 }
  0x8b   : > { %562 = vmatprep.subr.bf16.mxu0 %v561_v11 }
  0x8e   : > { %564 = vmatpush1.bf16.msra.mxu0 %v563_v16 }
  0x8f   : > { %566 = vmatprep.subr.bf16.mxu0 %v565_v17 }
  0x92   : > { %568 = vmatpush1.bf16.msra.mxu0 %v567_v22 }
  0x93   : > { %570 = vmatprep.subr.bf16.mxu0 %v569_v23 }
  0x96   : > { %572 = vmatpush1.bf16.msra.mxu0 %v571_v28 }
  0x97   : > { %574 = vmatprep.subr.bf16.mxu0 %v573_v29 }
  0x9a   : > { %576 = vmatpush1.bf16.msra.mxu0 %v575_v32 }
  0x9d   : > { %356 = vmatmul.mubr.f32.vlgmr.msra.gmra.mrb[0].mxu0 %v225_v33 }
 0x170   : > { %v357_v34 = vpop.f32.mrb[0].mxu0 }
 0x171   : > { %371 = vst [vmem:[%s212_s20] sm:$0xff] %v357_v34  ;;  %v359_v35 = vpop.f32.mrb[1].mxu0 }
 0x172   : > { %372 = vst [vmem:[%s212_s20 + $0x8] sm:$0xff] %v359_v35 }
 0x173   : > { %724 = shalt.err (!%p721_p7)
}
 0x174   : > { %s725_s8 = scalar_lea.hbm %s1059_s29, 256  ;;  %s729_s24 = scalar_lea.hbm %s1108_s2, 512 }
 0x175   : > { %p726_p13 = scmp.ne.s32.totalorder %s1059_s29, %s725_s8  ;;  %p730_p12 = scmp.lt.u32.totalorder %s1059_s29, %s1108_s2 }
 0x176   : > { %p731_p4 = scmp.lt.u32.totalorder %s729_s24, %s725_s8  ;;  %p733_p5 = scmp.lt.u32.totalorder %s725_s8, %s1059_s29 }
 0x177   : > { %p727_p2 = pnand %p726_p13, %p1129_p10 }
 0x178   : > { %p732_p8 = por %p731_p4, %p730_p12 }
 0x179   : > { %p728_p6 = pneg %p727_p2 }
 0x17a   : > { %p734_p11 = por %p733_p5, %p732_p8 }
 0x17c   : > { %p735_p1 = pnand %p734_p11, %p728_p6 }
 0x17e   : > { %738 = shalt.err (!%p735_p1)
}
 0x17f   : > { %583 = dma.vmem_to_hbm [thread:$0]  (%p1129_p10), %s1054_s23, 256, %s1059_s29, %s374_s17  }
 0x180 PF: > { %s402_s5 = sand.u32 1, %s777_s9   ;;  %p1130_p0 = scmp.ne.s32.totalorder %s1119_s22, 0 }
 0x181   : > { %p1131_p9 = scmp.ge.s32.totalorder %s797_s14, 2  ;;  %s403_s18 = scalar_lea.sflag [#allocation5], %s402_s5 }
 0x183   : > { %p594_p3 = pnand %p1131_p9, %p1130_p0 }
 0x185   : > { %772 = dma.done.wait (!%p594_p3), %s403_s18, 256  }
 0x186   : > { %774 = vsyncadd (!%p594_p3), %s403_s18, 4294967040  ;;  %s19_s14 = sadd.s32 1, %s797_s14   ;;  %s1132_s9 = smov %s781_s10 }
 0x187   : > { %p16_p7 = scmp.ge.s32.totalorder %s19_s14, 4   ;;  %s1133_s10 = smov %s785_s11 }
 0x188   : > { %s1134_s11 = smov %s939_s25  ;;  %s1135_s12 = smov %s793_s13 }
 0x189   : > { %s1136_s13 = smov %s1138_s28  ;;  %18 = sbr.rel (!%p16_p7) target bundleno = 7 (0x7), region = 87 }
 0x190   :  { %408 = vsyncpa [#allocation4], 1 }
 0x191   :  { %410 = vsyncpa [#allocation4 + $0x1], 1 }
 0x192   :  { %411 = vsyncpa [#allocation7], 1 }
 0x193   :  { %413 = vsyncpa [#allocation7 + $0x1], 1 }
 0x194   :  { %414 = vsyncpa [#allocation5], 1 }
 0x195   :  { %416 = vsyncpa [#allocation5 + $0x1], 1 }

</bundles_post_ra>
